<compile_context>
chip_gen: v5e
topology: v5e:2x2
jax: 0.10.0
libtpu: 0.0.40
codegen_flags: <defaults>
</compile_context>

<pallas_src>
import functools

import jax
import jax.numpy as jnp
from jax.experimental import pallas as pl
from jax.experimental.pallas import tpu as pltpu


def _round_up(x, m):
    return ((x + m - 1) // m) * m


def _encode(x, w1, b1, w2, b2, w3, b3, *, cdt, final_f32):
    """3-layer Linear+ReLU encoder for one batch tile (MXU matmuls, f32 accumulate)."""
    f32 = jnp.float32
    h = jnp.maximum(jnp.dot(x, w1, preferred_element_type=f32) + b1, 0.0).astype(cdt)
    h = jnp.maximum(jnp.dot(h, w2, preferred_element_type=f32) + b2, 0.0).astype(cdt)
    h = jnp.maximum(jnp.dot(h, w3, preferred_element_type=f32) + b3, 0.0)
    return h if final_f32 else h.astype(cdt)


def _reward_kernel(s_ref, a_ref,
                   sw1_ref, sb1_ref, sw2_ref, sb2_ref, sw3_ref, sb3_ref,
                   aw1_ref, ab1_ref, aw2_ref, ab2_ref, aw3_ref, ab3_ref,
                   lws_ref, lwa_ref, lb_ref, out_ref, *, vpu_final: bool):
    """One batch tile of the Reward forward pass (both encoder branches + head)."""
    f32 = jnp.float32
    cdt = sw1_ref.dtype          # matmul input dtype (f32 or bf16); accumulate is f32

    s = s_ref[...].astype(cdt)
    a = a_ref[...].astype(cdt)

    # Two independent encoder branches -> per-branch dots (no block-diagonal
    # packing: that doubles MXU FLOPs / weight VMEM once 2*hidden > MXU tile).
    hs = _encode(s, sw1_ref[...], sb1_ref[...], sw2_ref[...], sb2_ref[...],
                 sw3_ref[...], sb3_ref[...], cdt=cdt, final_f32=vpu_final)
    ha = _encode(a, aw1_ref[...], ab1_ref[...], ab2_ref[...] * 0 + aw2_ref[...] if False else aw2_ref[...],
                 ab2_ref[...], aw3_ref[...], ab3_ref[...], cdt=cdt, final_f32=vpu_final) \
        if False else _encode(a, aw1_ref[...], ab1_ref[...], aw2_ref[...], ab2_ref[...],
                              aw3_ref[...], ab3_ref[...], cdt=cdt, final_f32=vpu_final)

    if vpu_final:
        # output_dim == 1: torch.cat + last Linear become two VPU multiplies +
        # lane reductions (an MXU push with N=1 wastes 127/255 output lanes).
        # lws/lwa are [1, E] f32 rows; hs/ha stay f32 (no f32->bf16->f32 trip).
        r = (jnp.sum(hs * lws_ref[...], axis=-1, keepdims=True)
             + jnp.sum(ha * lwa_ref[...], axis=-1, keepdims=True))
    else:
        # General output_dim: the concat is folded into two dots summed together.
        r = (jnp.dot(hs, lws_ref[...], preferred_element_type=f32)
             + jnp.dot(ha, lwa_ref[...], preferred_element_type=f32))
    out_ref[...] = (r + lb_ref[...]).astype(out_ref.dtype)
    # TODO(synk): if output_dim ever grows past ~8, present the output lane-dense
    # ([output_dim, blk]) to avoid masked vst.msk partial stores (worst on v5e).


def pack_params(params, dtype=jnp.float32):
    """Prepare kernel-side params ONCE at init.

    Matmul weights are cast to `dtype` (bf16 recommended on v6e/v7x for non-toy
    dims; keep f32 on v5e). Biases stay f32 (added after the f32 MXU accumulate).
    For output_dim == 1 the last fc weight is stored as two [1, E] f32 rows so
    the kernel uses a VPU reduce; the choice is recorded as an explicit flag.
    """
    (sw1, sb1, sw2, sb2, sw3, sb3,
     aw1, ab1, aw2, ab2, aw3, ab3, lws, lwa, lb) = params
    output_dim = lb.shape[-1]
    vpu_final = (output_dim == 1)

    f32 = jnp.float32
    if vpu_final:
        lws_p, lwa_p = lws.T.astype(f32), lwa.T.astype(f32)    # [1, E] row vectors
    else:
        lws_p, lwa_p = lws.astype(dtype), lwa.astype(dtype)    # [E, output_dim]

    weights = (sw1.astype(dtype), sb1.astype(f32),
               sw2.astype(dtype), sb2.astype(f32),
               sw3.astype(dtype), sb3.astype(f32),
               aw1.astype(dtype), ab1.astype(f32),
               aw2.astype(dtype), ab2.astype(f32),
               aw3.astype(dtype), ab3.astype(f32),
               lws_p, lwa_p, lb.astype(f32))
    return {"weights": weights, "vpu_final": vpu_final}


def _choose_block(batch, block_b, sublane):
    if batch <= 256:
        return _round_up(max(batch, sublane), sublane)          # single grid step
    # >= 2 "parallel" grid steps so v7x's second TensorCore gets work.
    return min(_round_up(block_b, sublane), _round_up(pl.cdiv(batch, 2), sublane))


@functools.partial(jax.jit, static_argnames=("vpu_final", "block_b"))
def _reward_forward_impl(state, action, weights, *, vpu_final, block_b):
    (sw1, sb1, sw2, sb2, sw3, sb3,
     aw1, ab1, aw2, ab2, aw3, ab3, lws, lwa, lb) = weights

    B, Ds = state.shape
    Da = action.shape[-1]
    H = sw1.shape[1]
    E = sw3.shape[1]
    output_dim = lb.shape[-1]
    assert action.shape[0] == B
    assert Ds == sw1.shape[0] and Da == aw1.shape[0], "packed params mismatch"

    cdt = sw1.dtype
    sublane = 16 if cdt == jnp.bfloat16 else 8   # bf16 packs 16 rows / vreg
    blk = _choose_block(B, block_b, sublane)
    grid = (pl.cdiv(B, blk),)                    # partial last block handled by Pallas

    nbytes = lambda t: int(t.size) * t.dtype.itemsize
    w_bytes = sum(nbytes(t) for t in weights)
    max_w = max(Ds, Da, H, E, output_dim)
    # 2x double-buffered in/out tiles + 2x weights (constant index maps -> fetched
    # once, but the pipeline still holds two buffers) + live f32 activations.
    est = (2 * blk * (Ds * state.dtype.itemsize + Da * action.dtype.itemsize)
           + 2 * blk * output_dim * 4
           + 2 * w_bytes
           + 6 * blk * max_w * 4)
    vmem_limit = int(min(max(2 * est, 8 << 20), 48 << 20))   # 48 MiB cap: v7x-safe

    flops = 2 * B * (Ds * H + Da * H + 2 * H * H + 2 * H * E + 2 * E * output_dim)
    cost = pl.CostEstimate(
        flops=flops, transcendentals=0,
        bytes_accessed=nbytes(state) + nbytes(action) + w_bytes + B * output_dim * 4)

    w_specs = [pl.BlockSpec(t.shape, lambda i: (0, 0)) for t in weights]
    in_specs = ([pl.BlockSpec((blk, Ds), lambda i: (i, 0)),
                 pl.BlockSpec((blk, Da), lambda i: (i, 0))]
                + w_specs)
    out_spec = pl.BlockSpec((blk, output_dim), lambda i: (i, 0))

    return pl.pallas_call(
        functools.partial(_reward_kernel, vpu_final=vpu_final),
        out_shape=jax.ShapeDtypeStruct((B, output_dim), jnp.float32),
        grid=grid,
        in_specs=in_specs,
        out_specs=out_spec,
        compiler_params=pltpu.CompilerParams(
            dimension_semantics=("parallel",),   # megacore / v7x 2-TC sharding
            vmem_limit_bytes=vmem_limit),
        cost_estimate=cost,
    )(state, action, *weights)


def reward_forward(state, action, packed, *, block_b=2048):
    """state: [B, state_dim], action: [B, action_dim] -> reward [B, output_dim]."""
    return _reward_forward_impl(state, action, packed["weights"],
                                vpu_final=packed["vpu_final"], block_b=block_b)


def init_params(key, state_dim, action_dim, hidden_dim, encode_dim, output_dim=1):
    """Deterministic synthetic init. Weights stored as [in, out] (transposed vs torch)."""
    keys = jax.random.split(key, 15)

    def lin(kw, kb, fan_in, fan_out):
        bound = 1.0 / jnp.sqrt(fan_in)
        w = jax.random.uniform(kw, (fan_in, fan_out), jnp.float32, -bound, bound)
        b = jax.random.uniform(kb, (1, fan_out), jnp.float32, -bound, bound)
        return w, b

    sw1, sb1 = lin(keys[0], keys[1], state_dim, hidden_dim)
    sw2, sb2 = lin(keys[2], keys[3], hidden_dim, hidden_dim)
    sw3, sb3 = lin(keys[4], keys[5], hidden_dim, encode_dim)
    aw1, ab1 = lin(keys[6], keys[7], action_dim, hidden_dim)
    aw2, ab2 = lin(keys[8], keys[9], hidden_dim, hidden_dim)
    aw3, ab3 = lin(keys[10], keys[11], hidden_dim, encode_dim)
    lw_full, lb = lin(keys[12], keys[13], encode_dim * 2, output_dim)
    lws = lw_full[:encode_dim, :]
    lwa = lw_full[encode_dim:, :]

    return (sw1, sb1, sw2, sb2, sw3, sb3,
            aw1, ab1, aw2, ab2, aw3, ab3,
            lws, lwa, lb)


def reward_reference(state, action, params):
    """Pure-JAX reference (unfused, mirrors the PyTorch module) for correctness."""
    (sw1, sb1, sw2, sb2, sw3, sb3,
     aw1, ab1, aw2, ab2, aw3, ab3,
     lws, lwa, lb) = params
    relu = lambda v: jnp.maximum(v, 0.0)
    s = relu(state @ sw1 + sb1)
    s = relu(s @ sw2 + sb2)
    s = relu(s @ sw3 + sb3)
    a = relu(action @ aw1 + ab1)
    a = relu(a @ aw2 + ab2)
    a = relu(a @ aw3 + ab3)
    cat = jnp.concatenate([s, a], axis=-1)
    w_full = jnp.concatenate([lws, lwa], axis=0)
    return cat @ w_full + lb


if __name__ == "__main__":
    # Small shapes consistent with the module's forward pass.
    B = 16
    state_dim, action_dim = 16, 8
    hidden_dim, encode_dim, output_dim = 32, 16, 1

    key = jax.random.PRNGKey(0)
    k_state, k_action, k_params, k_state2, k_action2 = jax.random.split(key, 5)

    params = init_params(k_params, state_dim, action_dim, hidden_dim, encode_dim, output_dim)
    packed = pack_params(params)   # built once (not per call); f32 path for toy dims

    # Small batch: single grid step (whole batch in one tile).
    state = jax.random.normal(k_state, (B, state_dim), jnp.float32)
    action = jax.random.normal(k_action, (B, action_dim), jnp.float32)
    reward = jax.block_until_ready(reward_forward(state, action, packed))
    expected = reward_reference(state, action, params)
    assert reward.shape == (B, output_dim)
    assert jnp.allclose(reward, expected, atol=1e-5, rtol=1e-5), "mismatch (small batch)"

    # Larger non-divisible batch: >=2 "parallel" grid steps (v7x 2 TCs) and a
    # partial last block handled by the grid (no host-side concat or pad).
    B2 = 300
    state2 = jax.random.normal(k_state2, (B2, state_dim), jnp.float32)
    action2 = jax.random.normal(k_action2, (B2, action_dim), jnp.float32)
    reward2 = jax.block_until_ready(reward_forward(state2, action2, packed))
    expected2 = reward_reference(state2, action2, params)
    assert reward2.shape == (B2, output_dim)
    assert jnp.allclose(reward2, expected2, atol=1e-5, rtol=1e-5), "mismatch (large batch)"

    print("KERNEL_OK")
</pallas_src>

<mosaic_0001>
module attributes {stable_mosaic.version = 11 : i64} {
  func.func @_reward_kernel(%arg0: i32, %arg1: memref<16x16xf32, #tpu.memory_space<vmem>>, %arg2: memref<16x8xf32, #tpu.memory_space<vmem>>, %arg3: memref<16x32xf32, #tpu.memory_space<vmem>>, %arg4: memref<1x32xf32, #tpu.memory_space<vmem>>, %arg5: memref<32x32xf32, #tpu.memory_space<vmem>>, %arg6: memref<1x32xf32, #tpu.memory_space<vmem>>, %arg7: memref<32x16xf32, #tpu.memory_space<vmem>>, %arg8: memref<1x16xf32, #tpu.memory_space<vmem>>, %arg9: memref<8x32xf32, #tpu.memory_space<vmem>>, %arg10: memref<1x32xf32, #tpu.memory_space<vmem>>, %arg11: memref<32x32xf32, #tpu.memory_space<vmem>>, %arg12: memref<1x32xf32, #tpu.memory_space<vmem>>, %arg13: memref<32x16xf32, #tpu.memory_space<vmem>>, %arg14: memref<1x16xf32, #tpu.memory_space<vmem>>, %arg15: memref<1x16xf32, #tpu.memory_space<vmem>>, %arg16: memref<1x16xf32, #tpu.memory_space<vmem>>, %arg17: memref<1x1xf32, #tpu.memory_space<vmem>>, %arg18: memref<16x1xf32, #tpu.memory_space<vmem>>) attributes {dimension_semantics = [#tpu.dimension_semantics<parallel>], iteration_bounds = array<i64: 1>, scalar_prefetch = 0 : i64, scratch_operands = 0 : i64, tpu.core_type = #tpu.core_type<tc>, window_params = [{transform_indices = @transform_0, window_bounds = array<i64: 16, 16>}, {transform_indices = @transform_1, window_bounds = array<i64: 16, 8>}, {pipeline_mode = #tpu.pipeline_mode<synchronous>, transform_indices = @transform_2, window_bounds = array<i64: 16, 32>}, {pipeline_mode = #tpu.pipeline_mode<synchronous>, transform_indices = @transform_3, window_bounds = array<i64: 1, 32>}, {pipeline_mode = #tpu.pipeline_mode<synchronous>, transform_indices = @transform_4, window_bounds = array<i64: 32, 32>}, {pipeline_mode = #tpu.pipeline_mode<synchronous>, transform_indices = @transform_5, window_bounds = array<i64: 1, 32>}, {pipeline_mode = #tpu.pipeline_mode<synchronous>, transform_indices = @transform_6, window_bounds = array<i64: 32, 16>}, {pipeline_mode = #tpu.pipeline_mode<synchronous>, transform_indices = @transform_7, window_bounds = array<i64: 1, 16>}, {pipeline_mode = #tpu.pipeline_mode<synchronous>, transform_indices = @transform_8, window_bounds = array<i64: 8, 32>}, {pipeline_mode = #tpu.pipeline_mode<synchronous>, transform_indices = @transform_9, window_bounds = array<i64: 1, 32>}, {pipeline_mode = #tpu.pipeline_mode<synchronous>, transform_indices = @transform_10, window_bounds = array<i64: 32, 32>}, {pipeline_mode = #tpu.pipeline_mode<synchronous>, transform_indices = @transform_11, window_bounds = array<i64: 1, 32>}, {pipeline_mode = #tpu.pipeline_mode<synchronous>, transform_indices = @transform_12, window_bounds = array<i64: 32, 16>}, {pipeline_mode = #tpu.pipeline_mode<synchronous>, transform_indices = @transform_13, window_bounds = array<i64: 1, 16>}, {pipeline_mode = #tpu.pipeline_mode<synchronous>, transform_indices = @transform_14, window_bounds = array<i64: 1, 16>}, {pipeline_mode = #tpu.pipeline_mode<synchronous>, transform_indices = @transform_15, window_bounds = array<i64: 1, 16>}, {pipeline_mode = #tpu.pipeline_mode<synchronous>, transform_indices = @transform_16, window_bounds = array<i64: 1, 1>}, {transform_indices = @transform_17, window_bounds = array<i64: 16, 1>}]} {
    %c0 = arith.constant 0 : index
    %c0_0 = arith.constant 0 : index
    %0 = vector.load %arg1[%c0, %c0_0] : memref<16x16xf32, #tpu.memory_space<vmem>>, vector<16x16xf32>
    %c0_1 = arith.constant 0 : index
    %c0_2 = arith.constant 0 : index
    %1 = vector.load %arg2[%c0_1, %c0_2] : memref<16x8xf32, #tpu.memory_space<vmem>>, vector<16x8xf32>
    %c0_3 = arith.constant 0 : index
    %c0_4 = arith.constant 0 : index
    %2 = vector.load %arg3[%c0_3, %c0_4] : memref<16x32xf32, #tpu.memory_space<vmem>>, vector<16x32xf32>
    %c0_5 = arith.constant 0 : index
    %c0_6 = arith.constant 0 : index
    %3 = vector.load %arg4[%c0_5, %c0_6] : memref<1x32xf32, #tpu.memory_space<vmem>>, vector<1x32xf32>
    %c0_7 = arith.constant 0 : index
    %c0_8 = arith.constant 0 : index
    %4 = vector.load %arg5[%c0_7, %c0_8] : memref<32x32xf32, #tpu.memory_space<vmem>>, vector<32x32xf32>
    %c0_9 = arith.constant 0 : index
    %c0_10 = arith.constant 0 : index
    %5 = vector.load %arg6[%c0_9, %c0_10] : memref<1x32xf32, #tpu.memory_space<vmem>>, vector<1x32xf32>
    %c0_11 = arith.constant 0 : index
    %c0_12 = arith.constant 0 : index
    %6 = vector.load %arg7[%c0_11, %c0_12] : memref<32x16xf32, #tpu.memory_space<vmem>>, vector<32x16xf32>
    %c0_13 = arith.constant 0 : index
    %c0_14 = arith.constant 0 : index
    %7 = vector.load %arg8[%c0_13, %c0_14] : memref<1x16xf32, #tpu.memory_space<vmem>>, vector<1x16xf32>
    %cst = arith.constant dense<0.000000e+00> : vector<16x32xf32>
    %8 = tpu.matmul %0, %2, %cst {dimension_numbers = #tpu.dot_dimension_numbers<[1], [0], [0], [1], [0, 0, 1, 1], [], []>} : vector<16x16xf32>, vector<16x32xf32>, vector<16x32xf32> -> vector<16x32xf32>
    %9 = vector.broadcast %3 : vector<1x32xf32> to vector<16x32xf32>
    %10 = arith.addf %8, %9 : vector<16x32xf32>
    %cst_15 = arith.constant 0.000000e+00 : f32
    %11 = vector.broadcast %cst_15 : f32 to vector<16x32xf32>
    %12 = arith.maximumf %10, %11 : vector<16x32xf32>
    %cst_16 = arith.constant dense<0.000000e+00> : vector<16x32xf32>
    %13 = tpu.matmul %12, %4, %cst_16 {dimension_numbers = #tpu.dot_dimension_numbers<[1], [0], [0], [1], [0, 0, 1, 1], [], []>} : vector<16x32xf32>, vector<32x32xf32>, vector<16x32xf32> -> vector<16x32xf32>
    %14 = vector.broadcast %5 : vector<1x32xf32> to vector<16x32xf32>
    %15 = arith.addf %13, %14 : vector<16x32xf32>
    %cst_17 = arith.constant 0.000000e+00 : f32
    %16 = vector.broadcast %cst_17 : f32 to vector<16x32xf32>
    %17 = arith.maximumf %15, %16 : vector<16x32xf32>
    %cst_18 = arith.constant dense<0.000000e+00> : vector<16x16xf32>
    %18 = tpu.matmul %17, %6, %cst_18 {dimension_numbers = #tpu.dot_dimension_numbers<[1], [0], [0], [1], [0, 0, 1, 1], [], []>} : vector<16x32xf32>, vector<32x16xf32>, vector<16x16xf32> -> vector<16x16xf32>
    %19 = vector.broadcast %7 : vector<1x16xf32> to vector<16x16xf32>
    %20 = arith.addf %18, %19 : vector<16x16xf32>
    %cst_19 = arith.constant 0.000000e+00 : f32
    %21 = vector.broadcast %cst_19 : f32 to vector<16x16xf32>
    %22 = arith.maximumf %20, %21 : vector<16x16xf32>
    %c0_20 = arith.constant 0 : index
    %c0_21 = arith.constant 0 : index
    %23 = vector.load %arg9[%c0_20, %c0_21] : memref<8x32xf32, #tpu.memory_space<vmem>>, vector<8x32xf32>
    %c0_22 = arith.constant 0 : index
    %c0_23 = arith.constant 0 : index
    %24 = vector.load %arg10[%c0_22, %c0_23] : memref<1x32xf32, #tpu.memory_space<vmem>>, vector<1x32xf32>
    %c0_24 = arith.constant 0 : index
    %c0_25 = arith.constant 0 : index
    %25 = vector.load %arg11[%c0_24, %c0_25] : memref<32x32xf32, #tpu.memory_space<vmem>>, vector<32x32xf32>
    %c0_26 = arith.constant 0 : index
    %c0_27 = arith.constant 0 : index
    %26 = vector.load %arg12[%c0_26, %c0_27] : memref<1x32xf32, #tpu.memory_space<vmem>>, vector<1x32xf32>
    %c0_28 = arith.constant 0 : index
    %c0_29 = arith.constant 0 : index
    %27 = vector.load %arg13[%c0_28, %c0_29] : memref<32x16xf32, #tpu.memory_space<vmem>>, vector<32x16xf32>
    %c0_30 = arith.constant 0 : index
    %c0_31 = arith.constant 0 : index
    %28 = vector.load %arg14[%c0_30, %c0_31] : memref<1x16xf32, #tpu.memory_space<vmem>>, vector<1x16xf32>
    %cst_32 = arith.constant dense<0.000000e+00> : vector<16x32xf32>
    %29 = tpu.matmul %1, %23, %cst_32 {dimension_numbers = #tpu.dot_dimension_numbers<[1], [0], [0], [1], [0, 0, 1, 1], [], []>} : vector<16x8xf32>, vector<8x32xf32>, vector<16x32xf32> -> vector<16x32xf32>
    %30 = vector.broadcast %24 : vector<1x32xf32> to vector<16x32xf32>
    %31 = arith.addf %29, %30 : vector<16x32xf32>
    %cst_33 = arith.constant 0.000000e+00 : f32
    %32 = vector.broadcast %cst_33 : f32 to vector<16x32xf32>
    %33 = arith.maximumf %31, %32 : vector<16x32xf32>
    %cst_34 = arith.constant dense<0.000000e+00> : vector<16x32xf32>
    %34 = tpu.matmul %33, %25, %cst_34 {dimension_numbers = #tpu.dot_dimension_numbers<[1], [0], [0], [1], [0, 0, 1, 1], [], []>} : vector<16x32xf32>, vector<32x32xf32>, vector<16x32xf32> -> vector<16x32xf32>
    %35 = vector.broadcast %26 : vector<1x32xf32> to vector<16x32xf32>
    %36 = arith.addf %34, %35 : vector<16x32xf32>
    %cst_35 = arith.constant 0.000000e+00 : f32
    %37 = vector.broadcast %cst_35 : f32 to vector<16x32xf32>
    %38 = arith.maximumf %36, %37 : vector<16x32xf32>
    %cst_36 = arith.constant dense<0.000000e+00> : vector<16x16xf32>
    %39 = tpu.matmul %38, %27, %cst_36 {dimension_numbers = #tpu.dot_dimension_numbers<[1], [0], [0], [1], [0, 0, 1, 1], [], []>} : vector<16x32xf32>, vector<32x16xf32>, vector<16x16xf32> -> vector<16x16xf32>
    %40 = vector.broadcast %28 : vector<1x16xf32> to vector<16x16xf32>
    %41 = arith.addf %39, %40 : vector<16x16xf32>
    %cst_37 = arith.constant 0.000000e+00 : f32
    %42 = vector.broadcast %cst_37 : f32 to vector<16x16xf32>
    %43 = arith.maximumf %41, %42 : vector<16x16xf32>
    %c0_38 = arith.constant 0 : index
    %c0_39 = arith.constant 0 : index
    %44 = vector.load %arg15[%c0_38, %c0_39] : memref<1x16xf32, #tpu.memory_space<vmem>>, vector<1x16xf32>
    %45 = vector.broadcast %44 : vector<1x16xf32> to vector<16x16xf32>
    %46 = arith.mulf %22, %45 : vector<16x16xf32>
    %cst_40 = arith.constant dense<0.000000e+00> : vector<16xf32>
    %47 = vector.multi_reduction <add>, %46, %cst_40 [1] : vector<16x16xf32> to vector<16xf32>
    %48 = vector.shape_cast %47 : vector<16xf32> to vector<16x1xf32>
    %c0_41 = arith.constant 0 : index
    %c0_42 = arith.constant 0 : index
    %49 = vector.load %arg16[%c0_41, %c0_42] : memref<1x16xf32, #tpu.memory_space<vmem>>, vector<1x16xf32>
    %50 = vector.broadcast %49 : vector<1x16xf32> to vector<16x16xf32>
    %51 = arith.mulf %43, %50 : vector<16x16xf32>
    %cst_43 = arith.constant dense<0.000000e+00> : vector<16xf32>
    %52 = vector.multi_reduction <add>, %51, %cst_43 [1] : vector<16x16xf32> to vector<16xf32>
    %53 = vector.shape_cast %52 : vector<16xf32> to vector<16x1xf32>
    %54 = arith.addf %48, %53 : vector<16x1xf32>
    %c0_44 = arith.constant 0 : index
    %c0_45 = arith.constant 0 : index
    %55 = vector.load %arg17[%c0_44, %c0_45] : memref<1x1xf32, #tpu.memory_space<vmem>>, vector<1x1xf32>
    %56 = vector.broadcast %55 : vector<1x1xf32> to vector<16x1xf32>
    %57 = arith.addf %54, %56 : vector<16x1xf32>
    %c0_46 = arith.constant 0 : index
    %c0_47 = arith.constant 0 : index
    %58 = vector.load %arg18[%c0_46, %c0_47] : memref<16x1xf32, #tpu.memory_space<vmem>>, vector<16x1xf32>
    tpu.vector_store %arg18[%c0_46, %c0_47], %57 {strides = array<i32>} : memref<16x1xf32, #tpu.memory_space<vmem>>, vector<16x1xf32>,
    return
  }
  func.func @transform_0(%arg0: i32) -> (i32, i32) {
    %c0_i32 = arith.constant 0 : i32
    %c0_i32_0 = arith.constant 0 : i32
    return %arg0, %c0_i32 : i32, i32
  }
  func.func @transform_1(%arg0: i32) -> (i32, i32) {
    %c0_i32 = arith.constant 0 : i32
    %c0_i32_0 = arith.constant 0 : i32
    return %arg0, %c0_i32 : i32, i32
  }
  func.func @transform_2(%arg0: i32) -> (i32, i32) {
    %c0_i32 = arith.constant 0 : i32
    %c0_i32_0 = arith.constant 0 : i32
    %c0_i32_1 = arith.constant 0 : i32
    return %c0_i32, %c0_i32_0 : i32, i32
  }
  func.func @transform_3(%arg0: i32) -> (i32, i32) {
    %c0_i32 = arith.constant 0 : i32
    %c0_i32_0 = arith.constant 0 : i32
    %c0_i32_1 = arith.constant 0 : i32
    return %c0_i32, %c0_i32_0 : i32, i32
  }
  func.func @transform_4(%arg0: i32) -> (i32, i32) {
    %c0_i32 = arith.constant 0 : i32
    %c0_i32_0 = arith.constant 0 : i32
    %c0_i32_1 = arith.constant 0 : i32
    return %c0_i32, %c0_i32_0 : i32, i32
  }
  func.func @transform_5(%arg0: i32) -> (i32, i32) {
    %c0_i32 = arith.constant 0 : i32
    %c0_i32_0 = arith.constant 0 : i32
    %c0_i32_1 = arith.constant 0 : i32
    return %c0_i32, %c0_i32_0 : i32, i32
  }
  func.func @transform_6(%arg0: i32) -> (i32, i32) {
    %c0_i32 = arith.constant 0 : i32
    %c0_i32_0 = arith.constant 0 : i32
    %c0_i32_1 = arith.constant 0 : i32
    return %c0_i32, %c0_i32_0 : i32, i32
  }
  func.func @transform_7(%arg0: i32) -> (i32, i32) {
    %c0_i32 = arith.constant 0 : i32
    %c0_i32_0 = arith.constant 0 : i32
    %c0_i32_1 = arith.constant 0 : i32
    return %c0_i32, %c0_i32_0 : i32, i32
  }
  func.func @transform_8(%arg0: i32) -> (i32, i32) {
    %c0_i32 = arith.constant 0 : i32
    %c0_i32_0 = arith.constant 0 : i32
    %c0_i32_1 = arith.constant 0 : i32
    return %c0_i32, %c0_i32_0 : i32, i32
  }
  func.func @transform_9(%arg0: i32) -> (i32, i32) {
    %c0_i32 = arith.constant 0 : i32
    %c0_i32_0 = arith.constant 0 : i32
    %c0_i32_1 = arith.constant 0 : i32
    return %c0_i32, %c0_i32_0 : i32, i32
  }
  func.func @transform_10(%arg0: i32) -> (i32, i32) {
    %c0_i32 = arith.constant 0 : i32
    %c0_i32_0 = arith.constant 0 : i32
    %c0_i32_1 = arith.constant 0 : i32
    return %c0_i32, %c0_i32_0 : i32, i32
  }
  func.func @transform_11(%arg0: i32) -> (i32, i32) {
    %c0_i32 = arith.constant 0 : i32
    %c0_i32_0 = arith.constant 0 : i32
    %c0_i32_1 = arith.constant 0 : i32
    return %c0_i32, %c0_i32_0 : i32, i32
  }
  func.func @transform_12(%arg0: i32) -> (i32, i32) {
    %c0_i32 = arith.constant 0 : i32
    %c0_i32_0 = arith.constant 0 : i32
    %c0_i32_1 = arith.constant 0 : i32
    return %c0_i32, %c0_i32_0 : i32, i32
  }
  func.func @transform_13(%arg0: i32) -> (i32, i32) {
    %c0_i32 = arith.constant 0 : i32
    %c0_i32_0 = arith.constant 0 : i32
    %c0_i32_1 = arith.constant 0 : i32
    return %c0_i32, %c0_i32_0 : i32, i32
  }
  func.func @transform_14(%arg0: i32) -> (i32, i32) {
    %c0_i32 = arith.constant 0 : i32
    %c0_i32_0 = arith.constant 0 : i32
    %c0_i32_1 = arith.constant 0 : i32
    return %c0_i32, %c0_i32_0 : i32, i32
  }
  func.func @transform_15(%arg0: i32) -> (i32, i32) {
    %c0_i32 = arith.constant 0 : i32
    %c0_i32_0 = arith.constant 0 : i32
    %c0_i32_1 = arith.constant 0 : i32
    return %c0_i32, %c0_i32_0 : i32, i32
  }
  func.func @transform_16(%arg0: i32) -> (i32, i32) {
    %c0_i32 = arith.constant 0 : i32
    %c0_i32_0 = arith.constant 0 : i32
    %c0_i32_1 = arith.constant 0 : i32
    return %c0_i32, %c0_i32_0 : i32, i32
  }
  func.func @transform_17(%arg0: i32) -> (i32, i32) {
    %c0_i32 = arith.constant 0 : i32
    %c0_i32_0 = arith.constant 0 : i32
    return %arg0, %c0_i32 : i32, i32
  }
}

</mosaic_0001>

<bundles_post_ra>
// kernel: _reward_forward_impl.1
= control target key start
LH: loop header
LB: loop body
LE: loop exit
PB: predicated region body
PF: predicated region fallthrough
CT: control target
= control target key end

     0   :  { %s609_s0 = inlined_call_operand.vmem [shape: f32[16,16], index: 0, kind: input, shape index: {}]   ;;  %s610_s1 = inlined_call_operand.vmem [shape: f32[16,8], index: 1, kind: input, shape index: {}]   ;;  %s611_s2 = inlined_call_operand.hbm [shape: f32[16,32], index: 2, kind: input, shape index: {}]   ;;  %s612_s3 = inlined_call_operand.vmem [shape: f32[1,32], index: 3, kind: input, shape index: {}]   ;;  %s613_s4 = inlined_call_operand.vmem [shape: f32[32,32], index: 4, kind: input, shape index: {}]   ;;  %s614_s5 = inlined_call_operand.vmem [shape: f32[1,32], index: 5, kind: input, shape index: {}]   ;;  %s615_s6 = inlined_call_operand.vmem [shape: f32[32,16], index: 6, kind: input, shape index: {}]   ;;  %s616_s7 = inlined_call_operand.vmem [shape: f32[1,16], index: 7, kind: input, shape index: {}]   ;;  %s617_s8 = inlined_call_operand.vmem [shape: f32[8,32], index: 8, kind: input, shape index: {}]   ;;  %s618_s9 = inlined_call_operand.vmem [shape: f32[1,32], index: 9, kind: input, shape index: {}]   ;;  %s619_s10 = inlined_call_operand.vmem [shape: f32[32,32], index: 10, kind: input, shape index: {}]   ;;  %s620_s11 = inlined_call_operand.vmem [shape: f32[1,32], index: 11, kind: input, shape index: {}]   ;;  %s621_s12 = inlined_call_operand.vmem [shape: f32[32,16], index: 12, kind: input, shape index: {}]   ;;  %s622_s13 = inlined_call_operand.vmem [shape: f32[1,16], index: 13, kind: input, shape index: {}]   ;;  %s623_s14 = inlined_call_operand.vmem [shape: f32[1,16], index: 14, kind: input, shape index: {}]   ;;  %s624_s15 = inlined_call_operand.vmem [shape: f32[1,16], index: 15, kind: input, shape index: {}]   ;;  %s625_s16 = inlined_call_operand.<no memory space> [shape: f32[1,1], index: 16, kind: input, shape index: {}]   ;;  %s626_s17 = inlined_call_operand.vmem [shape: f32[16,1], index: 17, kind: output, shape index: {}]  }
   0x1   :  { %629 = sst [smem:[#allocation6_spill]] %s609_s0  ;;  %v22_v0 = vstv %s625_s16 }
   0x2   :  { %630 = sst [smem:[#allocation7_spill]] %s610_s1  ;;  %23 = vst [vmem:[#allocation2] sm:$0x1] %v22_v0 }
   0x3   :  { %24 = vsyncpa [#allocation4], 0  ;;  %s33_s28 = sshll.u32 %s611_s2, 4  ;;  %s403_s29 = smov [#allocation3]   ;;  %s34_s28 = int_to_ptr.hbm [resolvable:$true] %s33_s28 }
   0x4   :  { %s35_s0 = sshll.u32 %s403_s29, 4  ;;  %s404_s30 = smov 128   ;;  %s36_s0 = int_to_ptr.vmem [resolvable:$true] %s35_s0 }
   0x5   :  { %s405_s18 = smov 8  }
   0x6   :  { %41 = dma.hbm_to_vmem [thread:$0]  %s34_s28, 256, %s36_s0, [#allocation4], %s404_s30, %s404_s30, %s405_s18  }
   0x7   :  { %401 = dma.done.wait [#allocation4], 256  }
   0x8   :  { %402 = vsyncadd [#allocation4], 4294967040  ;;  %v79_v1 = vld [vmem:[#allocation3 + $0x8] sm:$0xff]  ;;  %v78_v2 = vld [vmem:[#allocation3] sm:$0xff]  ;;  %s631_s1 = sld [smem:[#allocation6_spill]]  ;;  %vm94_vm0 = vcmask 130048  }
   0x9   :  { %115 = vmatpush.msra.mxu0 %v79_v1  ;;  %362 = vmatpush.msra.mxu1 %v79_v1  ;;  %v84_v5 = vld [vmem:[%s613_s4 + $0x18] sm:$0xff]  ;;  %v83_v6 = vld [vmem:[%s613_s4 + $0x10] sm:$0xff]  ;;  %v82_v7 = vld [vmem:[%s613_s4 + $0x8] sm:$0xff]  ;;  %vm129_vm1 = vcmask 261120   ;;  %vm210_vm2 = vcmask 64512   ;;  %s632_s24 = sld [smem:[#allocation7_spill]] }
   0xa   :  { %v81_v8 = vld [vmem:[%s613_s4] sm:$0xff]  ;;  %v89_v9 = vld [vmem:[%s615_s6 + $0x18] sm:$0xff]  ;;  %v88_v17 = vld [vmem:[%s615_s6 + $0x10] sm:$0xff]  ;;  %vm342_vm3 = vcmask 7168  }
   0xb   :  { %116 = vmatpush.msra.mxu0 %v78_v2  ;;  %363 = vmatpush.msra.mxu1 %v78_v2  ;;  %v368_v10 = vld [vmem:[%s612_s3] ss:$0 sm:$0xff]  ;;  %v87_v18 = vld [vmem:[%s615_s6 + $0x8] sm:$0xff]  ;;  %v200_v30 = vld [vmem:[%s619_s10 + $0x18] sm:$0xff] }
   0xc   :  { %182 = vmatpush.msra.mxu2 %v89_v9  ;;  %v86_v19 = vld [vmem:[%s615_s6] sm:$0xff]  ;;  %v199_v31 = vld [vmem:[%s619_s10 + $0x10] sm:$0xff]  ;;  %v198_v32 = vld [vmem:[%s619_s10 + $0x8] sm:$0xff] }
   0xd   :  { %148 = vmatpush.msrb.mxu1 %v84_v5  ;;  %v195_v20 = vld [vmem:[%s617_s8] sm:$0xff]  ;;  %v205_v53 = vld [vmem:[%s621_s12 + $0x18] sm:$0xff]  ;;  %v204_v54 = vld [vmem:[%s621_s12 + $0x10] sm:$0xff] }
   0xe   :  { %v74_v3 = vld [vmem:[%s631_s1] sm:$0xff]  ;;  %v75_v4 = vld [vmem:[%s631_s1 + $0x8] sm:$0xff]  ;;  %183 = vmatpush.msra.mxu2 %v88_v17  ;;  %364 = vmatpush.msra.mxu3 %v195_v20 }
   0xf   :  { %350 = vmatmul.msk.f32.vlgmr.msra.gmra.mxu0 %vm94_vm0, %v74_v3  ;;  %351 = vmatmul.msk.f32.vlgmr.msra.gmra.mxu1 %vm94_vm0, %v75_v4  ;;  %v77_v21 = vld [vmem:[%s632_s24 + $0x8] sm:$0xff]  ;;  %v369_v22 = vld [vmem:[%s614_s5] ss:$0 sm:$0xff] }
  0x10   :  { %149 = vmatpush.msrb.mxu1 %v83_v6  ;;  %184 = vmatpush.msra.mxu2 %v87_v18  ;;  %v76_v29 = vld [vmem:[%s632_s24] sm:$0xff]  ;;  %v203_v55 = vld [vmem:[%s621_s12 + $0x8] sm:$0xff] }
  0x11   :  { %357 = vmatmul.msk.f32.vlgmr.msra.gmra.mxu3 %vm210_vm2, %v77_v21  ;;  %v197_v33 = vld [vmem:[%s619_s10] sm:$0xff]  ;;  %297 = vmatpush.msrb.mxu0 %v205_v53 }
  0x12   :  { %150 = vmatpush.msrb.mxu1 %v82_v7  ;;  %185 = vmatpush.msra.mxu2 %v86_v19  ;;  %v370_v34 = vld [vmem:[%s616_s7] ss:$0 sm:$0xff] }
  0x13   :  { %263 = vmatpush.msrb.mxu3 %v200_v30  ;;  %v371_v37 = vld [vmem:[%s623_s14] ss:$0 sm:$0xff]  ;;  %298 = vmatpush.msrb.mxu0 %v204_v54 }
  0x14   :  { %151 = vmatpush.msrb.mxu1 %v81_v8  ;;  %232 = vmatpush.msrb.mxu2 %v195_v20  ;;  %v372_v44 = vld [vmem:[%s618_s9] ss:$0 sm:$0xff] }
  0x15   :  { %264 = vmatpush.msrb.mxu3 %v199_v31  ;;  %299 = vmatpush.msrb.mxu0 %v203_v55  ;;  %v202_v56 = vld [vmem:[%s621_s12] sm:$0xff] }
  0x16   :  { %v373_v57 = vld [vmem:[%s620_s11] ss:$0 sm:$0xff] }
  0x17   :  { %265 = vmatpush.msrb.mxu3 %v198_v32  ;;  %300 = vmatpush.msrb.mxu0 %v202_v56  ;;  %v374_v0 = vld [vmem:[%s622_s13] ss:$0 sm:$0xff] }
  0x18   :  { %v375_v3 = vld [vmem:[%s624_s15] ss:$0 sm:$0xff] }
  0x19   :  { %266 = vmatpush.msrb.mxu3 %v197_v33 }
  0x8c   :  { %v118_v11 = vpop.f32.mrf.mxu0  ;;  %v121_v13 = vpop.f32.mrf.mxu1 }
  0x8d   :  { %v119_v12 = vadd.f32 %v368_v10, %v118_v11  ;;  %v122_v15 = vadd.f32 %v368_v10, %v121_v13  ;;  %v376_v13 = vld [vmem:[#allocation2] ss:$0 sm:$0xff] }
  0x8f   :  { %v124_v14 = vmax.f32 %v119_v12, 0.0  ;;  %v125_v16 = vmax.f32 %v122_v15, 0.0 }
  0x91   :  { %352 = vmatmul.msk.f32.vlgmr.msrb.gmra.mxu1 %vm129_vm1, %v124_v14 }
  0x94   :  { %v237_v49 = vpop.f32.mrf.mxu3 }
  0x95   :  { %v238_v51 = vadd.f32 %v372_v44, %v237_v49 }
  0x97   :  { %v241_v52 = vmax.f32 %v238_v51, 0.0 }
  0x99   :  { %353 = vmatmul.msk.f32.gmra.mxu1 %vm129_vm1, %v125_v16 }
 0x10e   :  { %v153_v23 = vpop.f32.mrf.mxu1 }
 0x10f   :  { %v154_v24 = vadd.f32 %v369_v22, %v153_v23 }
 0x111   :  { %v159_v25 = vmax.f32 %v154_v24, 0.0 }
 0x113   :  { %354 = vmatmul.msk.f32.vlgmr.msra.gmra.mxu2 %vm129_vm1, %v159_v25 }
 0x116   :  { %v156_v26 = vpop.f32.mrf.mxu1 }
 0x117   :  { %v157_v27 = vadd.f32 %v369_v22, %v156_v26 }
 0x119   :  { %v160_v28 = vmax.f32 %v157_v27, 0.0 }
 0x11b   :  { %355 = vmatmul.msk.f32.gmra.mxu2 %vm129_vm1, %v160_v28 }
 0x123   :  { %356 = vmatmul.msk.f32.vlgmr.msrb.gmra.mxu2 %vm210_vm2, %v76_v29 }
 0x196   :  { %v187_v35 = vpop.f32.mrf.mxu2 }
 0x197   :  { %v188_v36 = vadd.f32 %v370_v34, %v187_v35 }
 0x199   :  { %v193_v38 = vmax.f32 %v188_v36, 0.0 }
 0x19b   :  { %v314_v39 = vmul.f32 %v371_v37, %v193_v38 }
 0x19d   :  { %v316_v40 = vsel %vm94_vm0, %v314_v39, 0.0 }
 0x19e   :  { %v190_v41 = vpop.f32.mrf.mxu2  ;;  %317 = vadd.xlane.f32.xlu0 %v316_v40 }
 0x19f   :  { %v191_v42 = vadd.f32 %v370_v34, %v190_v41 }
 0x1a1   :  { %v194_v43 = vmax.f32 %v191_v42, 0.0 }
 0x1a3   :  { %v315_v45 = vmul.f32 %v371_v37, %v194_v43 }
 0x1a5   :  { %v319_v46 = vsel %vm94_vm0, %v315_v45, 0.0 }
 0x1a6   :  { %v234_v47 = vpop.f32.mrf.mxu2  ;;  %320 = vadd.xlane.f32.xlu0 %v319_v46 }
 0x1a7   :  { %v235_v48 = vadd.f32 %v372_v44, %v234_v47 }
 0x1a9   :  { %v240_v50 = vmax.f32 %v235_v48, 0.0 }
 0x1ab   :  { %358 = vmatmul.msk.f32.vlgmr.msrb.gmra.mxu3 %vm129_vm1, %v240_v50 }
 0x1b3   :  { %359 = vmatmul.msk.f32.gmra.mxu3 %vm129_vm1, %v241_v52 }
 0x211   :  { %v318_v12 = vpop.xlane.xlu0 %317 }
 0x219   :  { %v321_v17 = vpop.xlane.xlu0 %320 }
 0x22e   :  { %v268_v58 = vpop.f32.mrf.mxu3 }
 0x22f   :  { %v269_v59 = vadd.f32 %v373_v57, %v268_v58 }
 0x231   :  { %v274_v60 = vmax.f32 %v269_v59, 0.0 }
 0x233   :  { %360 = vmatmul.msk.f32.vlgmr.msrb.gmra.mxu0 %vm129_vm1, %v274_v60 }
 0x236   :  { %v271_v61 = vpop.f32.mrf.mxu3 }
 0x237   :  { %v272_v62 = vadd.f32 %v373_v57, %v271_v61 }
 0x239   :  { %v275_v63 = vmax.f32 %v272_v62, 0.0 }
 0x23b   :  { %361 = vmatmul.msk.f32.gmra.mxu0 %vm129_vm1, %v275_v63 }
 0x2b0   :  { %v302_v1 = vpop.f32.mrf.mxu0 }
 0x2b1   :  { %v303_v2 = vadd.f32 %v374_v0, %v302_v1 }
 0x2b3   :  { %v308_v4 = vmax.f32 %v303_v2, 0.0 }
 0x2b5   :  { %v326_v5 = vmul.f32 %v375_v3, %v308_v4 }
 0x2b7   :  { %v328_v6 = vsel %vm94_vm0, %v326_v5, 0.0 }
 0x2b8   :  { %v305_v7 = vpop.f32.mrf.mxu0  ;;  %329 = vadd.xlane.f32.xlu1 %v328_v6 }
 0x2b9   :  { %v306_v8 = vadd.f32 %v374_v0, %v305_v7 }
 0x2bb   :  { %v309_v9 = vmax.f32 %v306_v8, 0.0 }
 0x2bd   :  { %v327_v10 = vmul.f32 %v375_v3, %v309_v9 }
 0x2bf   :  { %v331_v11 = vsel %vm94_vm0, %v327_v10, 0.0 }
 0x2c0   :  { %332 = vadd.xlane.f32.xlu1 %v331_v11 }
 0x32b   :  { %v330_v14 = vpop.xlane.xlu1 %329 }
 0x32c   :  { %v334_v15 = vadd.f32 %v330_v14, %v318_v12 }
 0x32e   :  { %v340_v16 = vadd.f32 %v376_v13, %v334_v15 }
 0x330   :  { %343 = vst.msk [vmem:[%s626_s17] sm:$0xff] %vm342_vm3, %v340_v16 }
 0x333   :  { %v333_v18 = vpop.xlane.xlu1 %332 }
 0x334   :  { %v335_v19 = vadd.f32 %v333_v18, %v321_v17 }
 0x336   :  { %v341_v20 = vadd.f32 %v376_v13, %v335_v19 }
 0x338   :  { %344 = vst.msk [vmem:[%s626_s17 + $0x8] sm:$0xff] %vm342_vm3, %v341_v20 }
 0x339   :  { %349 = vsyncpa [#allocation4], 1 }

</bundles_post_ra>
